<compile_context>
chip_gen: v5e
topology: v5e:2x2
jax: 0.10.0
libtpu: 0.0.40
codegen_flags: <defaults>
</compile_context>

<pallas_src>
import functools

import jax
import jax.numpy as jnp
from jax.experimental import pallas as pl
from jax.experimental.pallas import tpu as pltpu


def _round_up(x, m):
    return ((x + m - 1) // m) * m


def _gcn_layer_kernel(x_ref, adj_ref, w_ref, b_ref, out_ref, sup_ref, *, apply_relu):
    """One GraphConvolution layer: out_tile = [relu](adj_row_tile @ (x @ W) + b)."""
    i = pl.program_id(1)

    # Feature transform once per batch element; reused by every adjacency row tile.
    @pl.when(i == 0)
    def _():
        sup_ref[...] = jnp.dot(
            x_ref[0], w_ref[...], preferred_element_type=jnp.float32
        )

    # Aggregation: (TM, N) @ (N, H) on the MXU, then bias (+ relu), lane-dense store.
    acc = jnp.dot(adj_ref[0], sup_ref[...], preferred_element_type=jnp.float32)
    acc = acc + b_ref[...]
    if apply_relu:
        acc = jnp.maximum(acc, 0.0)
    out_ref[0] = acc.astype(out_ref.dtype)


def _gcn_layer(x, adj, w, b, *, apply_relu, tm):
    B, n_p, f_p = x.shape
    h_p = w.shape[1]
    assert adj.shape == (B, n_p, n_p)
    assert n_p % tm == 0
    n_row_tiles = n_p // tm

    flops = 2 * B * n_p * f_p * h_p + 2 * B * n_p * n_p * h_p
    bytes_accessed = 4 * (x.size + adj.size + w.size + b.size + B * n_p * h_p)

    return pl.pallas_call(
        functools.partial(_gcn_layer_kernel, apply_relu=apply_relu),
        out_shape=jax.ShapeDtypeStruct((B, n_p, h_p), x.dtype),
        grid_spec=pltpu.PrefetchScalarGridSpec(
            num_scalar_prefetch=0,
            grid=(B, n_row_tiles),
            in_specs=[
                # Full node-feature slab for this batch (re-fetched only on batch change).
                pl.BlockSpec((1, n_p, f_p), lambda bb, ii: (bb, 0, 0)),
                # Adjacency row tile: bounded VMEM footprint, streams over ii.
                pl.BlockSpec((1, tm, n_p), lambda bb, ii: (bb, ii, 0)),
                # Weights / bias resident across the whole grid.
                pl.BlockSpec((f_p, h_p), lambda bb, ii: (0, 0)),
                pl.BlockSpec((1, h_p), lambda bb, ii: (0, 0)),
            ],
            out_specs=pl.BlockSpec((1, tm, h_p), lambda bb, ii: (bb, ii, 0)),
            scratch_shapes=[pltpu.VMEM((n_p, h_p), jnp.float32)],
        ),
        compiler_params=pltpu.CompilerParams(
            # batch axis is parallel (megacore on v7x); row-tile axis carries the
            # per-batch support scratch, so it is "arbitrary".
            dimension_semantics=("parallel", "arbitrary"),
            vmem_limit_bytes=48 * 1024 * 1024,
        ),
        cost_estimate=pl.CostEstimate(
            flops=int(flops), transcendentals=0, bytes_accessed=int(bytes_accessed)
        ),
    )(x, adj, w, b)


def gcn_forward(x, adj, w1, b1, w2, b2):
    """relu(adj @ (x @ W1) + b1) -> dropout(eval=identity) -> adj @ (. @ W2) + b2."""
    B, N, Fin = x.shape
    H = w1.shape[1]
    Fout = w2.shape[1]
    assert adj.shape == (B, N, N)

    LANE = 128
    fin_p = _round_up(Fin, LANE)
    h_p = _round_up(H, LANE)
    fout_p = _round_up(Fout, LANE)

    # Node padding + adjacency row-tile size (bounds the per-step adj VMEM block).
    if N > 256:
        tm = 256
        n_p = _round_up(N, tm)
    else:
        n_p = _round_up(N, 8)
        tm = n_p

    f32 = jnp.float32
    x_p = jnp.pad(x.astype(f32), ((0, 0), (0, n_p - N), (0, fin_p - Fin)))
    adj_p = jnp.pad(adj.astype(f32), ((0, 0), (0, n_p - N), (0, n_p - N)))
    w1_p = jnp.pad(w1.astype(f32), ((0, fin_p - Fin), (0, h_p - H)))
    b1_p = jnp.pad(b1.astype(f32).reshape(1, H), ((0, 0), (0, h_p - H)))
    w2_p = jnp.pad(w2.astype(f32), ((0, h_p - H), (0, fout_p - Fout)))
    b2_p = jnp.pad(b2.astype(f32).reshape(1, Fout), ((0, 0), (0, fout_p - Fout)))

    # NOTE: on bf16-native MXUs (v6e/v7x), casting x_p/adj_p/w*_p to bfloat16 here
    # (keeping f32 accumulation via preferred_element_type) halves HBM traffic;
    # kept f32 to match the f32 PyTorch reference within tight tolerance.

    h = _gcn_layer(x_p, adj_p, w1_p, b1_p, apply_relu=True, tm=tm)
    # TODO(synk): training-mode dropout (pltpu.prng_random_bits mask) not emitted;
    # forward matches inference (training=False), where F.dropout is the identity.
    out = _gcn_layer(h, adj_p, w2_p, b2_p, apply_relu=False, tm=tm)

    return out[:, :N, :Fout].astype(x.dtype)


def reference_gcn(x, adj, w1, b1, w2, b2):
    # Pure-JAX reference of the PyTorch forward (eval mode).
    h = jnp.einsum("bnm,bmh->bnh", adj, jnp.einsum("bnf,fh->bnh", x, w1)) + b1
    h = jnp.maximum(h, 0.0)
    return jnp.einsum("bnm,bmh->bnh", adj, jnp.einsum("bnf,fh->bnh", h, w2)) + b2


if __name__ == "__main__":
    # Small shapes consistent with the module's forward signature.
    B, N = 2, 8            # batch_size, node_num
    IN_FEAT, NHID, OUT_FEAT = 16, 32, 16

    key = jax.random.PRNGKey(0)
    k_x, k_adj, k_w1, k_b1, k_w2, k_b2 = jax.random.split(key, 6)

    x = jax.random.normal(k_x, (B, N, IN_FEAT), dtype=jnp.float32)

    # Symmetric, row-normalized adjacency (deterministic).
    a = jax.random.uniform(k_adj, (B, N, N), dtype=jnp.float32)
    adj = (a + jnp.swapaxes(a, 1, 2)) * 0.5
    adj = adj / jnp.sum(adj, axis=-1, keepdims=True)

    # Deterministic init mimicking GraphConvolution.reset_parameters.
    stdv1 = 1.0 / jnp.sqrt(jnp.float32(NHID))
    stdv2 = 1.0 / jnp.sqrt(jnp.float32(OUT_FEAT))
    w1 = jax.random.uniform(k_w1, (IN_FEAT, NHID), jnp.float32, -stdv1, stdv1)
    b1 = jax.random.uniform(k_b1, (NHID,), jnp.float32, -stdv1, stdv1)
    w2 = jax.random.uniform(k_w2, (NHID, OUT_FEAT), jnp.float32, -stdv2, stdv2)
    b2 = jax.random.uniform(k_b2, (OUT_FEAT,), jnp.float32, -stdv2, stdv2)

    out = jax.block_until_ready(gcn_forward(x, adj, w1, b1, w2, b2))
    ref = reference_gcn(x, adj, w1, b1, w2, b2)

    assert out.shape == (B, N, OUT_FEAT)
    assert jnp.allclose(out, ref, atol=1e-5, rtol=1e-5), "mismatch vs reference"

    print("KERNEL_OK")
</pallas_src>

<mosaic_0001>
module attributes {stable_mosaic.version = 11 : i64} {
  func.func @_gcn_layer_kernel(%arg0: i32, %arg1: i32, %arg2: memref<1x8x128xf32, #tpu.memory_space<vmem>>, %arg3: memref<1x8x8xf32, #tpu.memory_space<vmem>>, %arg4: memref<128x128xf32, #tpu.memory_space<vmem>>, %arg5: memref<1x128xf32, #tpu.memory_space<vmem>>, %arg6: memref<1x8x128xf32, #tpu.memory_space<vmem>>, %arg7: memref<8x128xf32, #tpu.memory_space<vmem>>) attributes {dimension_semantics = [#tpu.dimension_semantics<parallel>, #tpu.dimension_semantics<arbitrary>], iteration_bounds = array<i64: 2, 1>, scalar_prefetch = 0 : i64, scratch_operands = 1 : i64, tpu.core_type = #tpu.core_type<tc>, window_params = [{transform_indices = @transform_0, window_bounds = array<i64: 1, 8, 128>}, {transform_indices = @transform_1, window_bounds = array<i64: 1, 8, 8>}, {pipeline_mode = #tpu.pipeline_mode<synchronous>, transform_indices = @transform_2, window_bounds = array<i64: 128, 128>}, {pipeline_mode = #tpu.pipeline_mode<synchronous>, transform_indices = @transform_3, window_bounds = array<i64: 1, 128>}, {transform_indices = @transform_4, window_bounds = array<i64: 1, 8, 128>}]} {
    %c0_i32 = arith.constant 0 : i32
    %0 = arith.cmpi eq, %arg1, %c0_i32 : i32
    %1 = arith.extui %0 : i1 to i32
    %c0_i32_0 = arith.constant 0 : i32
    %2 = arith.cmpi ne, %1, %c0_i32_0 : i32
    scf.if %2 {
      %c0_11 = arith.constant 0 : index
      %c0_12 = arith.constant 0 : index
      %c0_13 = arith.constant 0 : index
      %15 = vector.load %arg2[%c0_11, %c0_12, %c0_13] : memref<1x8x128xf32, #tpu.memory_space<vmem>>, vector<1x8x128xf32>
      %16 = vector.shape_cast %15 : vector<1x8x128xf32> to vector<8x128xf32>
      %c0_14 = arith.constant 0 : index
      %c0_15 = arith.constant 0 : index
      %17 = vector.load %arg4[%c0_14, %c0_15] : memref<128x128xf32, #tpu.memory_space<vmem>>, vector<128x128xf32>
      %cst_16 = arith.constant dense<0.000000e+00> : vector<8x128xf32>
      %18 = tpu.matmul %16, %17, %cst_16 {dimension_numbers = #tpu.dot_dimension_numbers<[1], [0], [0], [1], [0, 0, 1, 1], [], []>} : vector<8x128xf32>, vector<128x128xf32>, vector<8x128xf32> -> vector<8x128xf32>
      %c0_17 = arith.constant 0 : index
      %c0_18 = arith.constant 0 : index
      %19 = vector.load %arg7[%c0_17, %c0_18] : memref<8x128xf32, #tpu.memory_space<vmem>>, vector<8x128xf32>
      tpu.vector_store %arg7[%c0_17, %c0_18], %18 {strides = array<i32>} : memref<8x128xf32, #tpu.memory_space<vmem>>, vector<8x128xf32>,
    } else {
    }
    %c0 = arith.constant 0 : index
    %c0_1 = arith.constant 0 : index
    %c0_2 = arith.constant 0 : index
    %3 = vector.load %arg3[%c0, %c0_1, %c0_2] : memref<1x8x8xf32, #tpu.memory_space<vmem>>, vector<1x8x8xf32>
    %4 = vector.shape_cast %3 : vector<1x8x8xf32> to vector<8x8xf32>
    %c0_3 = arith.constant 0 : index
    %c0_4 = arith.constant 0 : index
    %5 = vector.load %arg7[%c0_3, %c0_4] : memref<8x128xf32, #tpu.memory_space<vmem>>, vector<8x128xf32>
    %cst = arith.constant dense<0.000000e+00> : vector<8x128xf32>
    %6 = tpu.matmul %4, %5, %cst {dimension_numbers = #tpu.dot_dimension_numbers<[1], [0], [0], [1], [0, 0, 1, 1], [], []>} : vector<8x8xf32>, vector<8x128xf32>, vector<8x128xf32> -> vector<8x128xf32>
    %c0_5 = arith.constant 0 : index
    %c0_6 = arith.constant 0 : index
    %7 = vector.load %arg5[%c0_5, %c0_6] : memref<1x128xf32, #tpu.memory_space<vmem>>, vector<1x128xf32>
    %8 = vector.broadcast %7 : vector<1x128xf32> to vector<8x128xf32>
    %9 = arith.addf %6, %8 : vector<8x128xf32>
    %cst_7 = arith.constant 0.000000e+00 : f32
    %10 = vector.broadcast %cst_7 : f32 to vector<8x128xf32>
    %11 = arith.maximumf %9, %10 : vector<8x128xf32>
    %c0_8 = arith.constant 0 : index
    %c0_9 = arith.constant 0 : index
    %c0_10 = arith.constant 0 : index
    %12 = vector.load %arg6[%c0_8, %c0_9, %c0_10] : memref<1x8x128xf32, #tpu.memory_space<vmem>>, vector<1x8x128xf32>
    %13 = vector.shape_cast %12 : vector<1x8x128xf32> to vector<8x128xf32>
    %14 = vector.shape_cast %11 : vector<8x128xf32> to vector<1x8x128xf32>
    tpu.vector_store %arg6[%c0_8, %c0_9, %c0_10], %14 {strides = array<i32>} : memref<1x8x128xf32, #tpu.memory_space<vmem>>, vector<1x8x128xf32>,
    return
  }
  func.func @transform_0(%arg0: i32, %arg1: i32) -> (i32, i32, i32) {
    %c0_i32 = arith.constant 0 : i32
    %c0_i32_0 = arith.constant 0 : i32
    %c0_i32_1 = arith.constant 0 : i32
    return %arg0, %c0_i32, %c0_i32_0 : i32, i32, i32
  }
  func.func @transform_1(%arg0: i32, %arg1: i32) -> (i32, i32, i32) {
    %c0_i32 = arith.constant 0 : i32
    %c0_i32_0 = arith.constant 0 : i32
    return %arg0, %arg1, %c0_i32 : i32, i32, i32
  }
  func.func @transform_2(%arg0: i32, %arg1: i32) -> (i32, i32) {
    %c0_i32 = arith.constant 0 : i32
    %c0_i32_0 = arith.constant 0 : i32
    %c0_i32_1 = arith.constant 0 : i32
    return %c0_i32, %c0_i32_0 : i32, i32
  }
  func.func @transform_3(%arg0: i32, %arg1: i32) -> (i32, i32) {
    %c0_i32 = arith.constant 0 : i32
    %c0_i32_0 = arith.constant 0 : i32
    %c0_i32_1 = arith.constant 0 : i32
    return %c0_i32, %c0_i32_0 : i32, i32
  }
  func.func @transform_4(%arg0: i32, %arg1: i32) -> (i32, i32, i32) {
    %c0_i32 = arith.constant 0 : i32
    %c0_i32_0 = arith.constant 0 : i32
    return %arg0, %arg1, %c0_i32 : i32, i32, i32
  }
}

</mosaic_0001>

<bundles_post_ra>
// kernel: tpu_custom_call.1
= control target key start
LH: loop header
LB: loop body
LE: loop exit
PB: predicated region body
PF: predicated region fallthrough
CT: control target
= control target key end

     0   :  { %s964_s0 = inlined_call_operand.hbm [shape: f32[2,8,128], index: 0, kind: input, shape index: {}]   ;;  %s965_s1 = inlined_call_operand.hbm [shape: f32[2,8,8], index: 1, kind: input, shape index: {}]   ;;  %s966_s2 = inlined_call_operand.hbm [shape: f32[128,128], index: 2, kind: input, shape index: {}]   ;;  %s967_s3 = inlined_call_operand.vmem [shape: f32[1,128], index: 3, kind: input, shape index: {}]   ;;  %s968_s4 = inlined_call_operand.hbm [shape: f32[2,8,128], index: 4, kind: output, shape index: {}]  }
   0x1   :  { %972 = sst [smem:[#allocation18_spill]] %s966_s2 }
   0x2   :  { %9 = vsyncpa [#allocation4], 0 }
   0x3   :  { %11 = vsyncpa [#allocation4 + $0x1], 0 }
   0x4   :  { %12 = vsyncpa [#allocation7], 0 }
   0x5   :  { %14 = vsyncpa [#allocation7 + $0x1], 0 }
   0x6   :  { %15 = vsyncpa [#allocation5], 0 }
   0x7   :  { %17 = vsyncpa [#allocation5 + $0x1], 0  ;;  %s800_s15 = smov 0   ;;  %s802_s16 = smov 0  }
   0x8   :  { %s804_s17 = smov 0   ;;  %s806_s18 = smov 0  }
   0x9   :  { %s808_s19 = smov 0   ;;  %s810_s20 = smov 0  }
   0xa LB: > { %973 = sst [smem:[#allocation14_spill]] %s758_s17  ;;  %s831_s21 = sadd.s32 4294967295, %s770_s20   ;;  %s770_s20 = sphi %s810_s20, %s23_s20   ;;  %s766_s19 = sphi %s808_s19, %s986_s19   ;;  %s762_s18 = sphi %s806_s18, %s985_s18   ;;  %s758_s17 = sphi %s804_s17, %s984_s17   ;;  %s754_s16 = sphi %s802_s16, %s988_s16   ;;  %s750_s15 = sphi %s800_s15, %s987_s15  }
   0xb   : > { %974 = sst [smem:[#allocation15_spill]] %s766_s19  ;;  %p492_p0 = scmp.ge.s32.totalorder %s770_s20, 1 }
   0xc   : > { %p56_p1 = scmp.eq.s32.totalorder %s831_s21, 0  ;;  %p164_p2 = scmp.lt.s32.totalorder %s770_s20, 3 }
   0xd   : > { %s975_s2 = sld [smem:[#allocation18_spill]]  ;;  %s772_s26 = smov [#allocation8]  }
   0xe   : > { %p839_p3 = pnand %p492_p0, %p164_p2  ;;  %s177_s27 = sshll.u32 %s772_s26, 4  ;;  %s178_s27 = int_to_ptr.vmem [resolvable:$true] %s177_s27 }
   0xf   : > { %p494_p6 = scmp.ge.s32.totalorder %s770_s20, 2  ;;  %s773_s28 = smov 128  }
  0x10   : > { %p519_p4 = pneg %p839_p3  ;;  %s774_s29 = smov 8  }
  0x11   : > { %s491_s30 = sadd.s32 4294967294, %s770_s20   ;;  %s35_s5 = sadd.s32 1, %s766_s19 }
  0x12   : > { %p520_p5 = pnand %p519_p4, %p56_p1  ;;  %s42_s6 = sadd.s32 1, %s758_s17 }
  0x13   : > { %s175_s24 = sshll.u32 %s975_s2, 4  ;;  %p37_p7 = scmp.ge.s32.totalorder %s35_s5, 2  ;;  %s176_s24 = int_to_ptr.hbm [resolvable:$true] %s175_s24 }
  0x14   : > { %522 = dma.hbm_to_vmem [thread:$0]  (!%p520_p5), %s176_s24, 2048, %s178_s27, [#allocation7], %s773_s28, %s773_s28, %s774_s29  }
  0x15   : > { %p49_p8 = scmp.ne.s32.totalorder %s758_s17, %s754_s16  ;;  %p50_p9 = scmp.eq.s32.totalorder %s770_s20, 0 }
  0x16   : > { %p55_p10 = scmp.ne.s32.totalorder %s754_s16, %s750_s15  ;;  %s990_s5 = smov (%p37_p7, %s35_s5), 0 }
  0x17   : > { %977 = sst [smem:[#allocation16_spill]] %s990_s5  ;;  %p858_p11 = por %p50_p9, %p49_p8 }
  0x18   : > { %p864_p12 = por %p56_p1, %p55_p10  ;;  %s39_s9 = ssub.s32 %s766_s19, %s990_s5 }
  0x19   : > { %p151_p13 = scmp.eq.s32.totalorder %s831_s21, 1  ;;  %p40_p0 = scmp.eq.s32.totalorder %s39_s9, 0 }
  0x1a   : > { %p157_p2 = scmp.eq.s32.totalorder %s491_s30, 1  ;;  %p535_p5 = scmp.lt.s32.totalorder %s770_s20, 2 }
  0x1b   : > { %p871_p4 = por %p151_p13, %p49_p8  ;;  %s194_s13 = sand.u32 1, %s758_s17  }
  0x1c   : > { %s877_s11 = scalar_select %p40_p0, %s758_s17, %s42_s6  }
  0x1d   : > { %p879_p7 = por %p157_p2, %p55_p10  ;;  %s495_s14 = sshll.u32 %s194_s13, 3 }
  0x1e   : > { %981 = sst [smem:[#allocation17_spill]] %s877_s11  ;;  %s496_s22 = sshll.u32 %s766_s19, 3 }
  0x1f   : > { %s202_s26 = scalar_lea.hbm %s964_s0, %s496_s22  ;;  %s198_s27 = scalar_lea.vmem [#allocation3], %s495_s14 }
  0x20   : > { %s206_s28 = sshll.u32 %s198_s27, 4  ;;  %s204_s29 = sshll.u32 %s202_s26, 4  ;;  %s207_s28 = int_to_ptr.vmem [resolvable:$true] %s206_s28  ;;  %s205_s29 = int_to_ptr.hbm [resolvable:$true] %s204_s29 }
  0x21   : > { %p524_p8 = pnand %p535_p5, %p858_p11  ;;  %s222_s9 = scalar_lea.hbm %s965_s1, %s496_s22 }
  0x22   : > { %s213_s2 = sand.u32 1, %s770_s20   ;;  %s195_s5 = scalar_lea.sflag [#allocation4], %s194_s13 }
  0x23   : > { %526 = dma.hbm_to_vmem [thread:$0]  (!%p524_p8), %s205_s29, 128, %s207_s28, %s195_s5  }
  0x24   : > { %s224_s11 = sshll.u32 %s222_s9, 4  ;;  %s217_s19 = scalar_lea.vmem [#allocation6], %s495_s14  ;;  %s225_s11 = int_to_ptr.hbm [resolvable:$true] %s224_s11 }
  0x25   : > { %s226_s17 = sshll.u32 %s217_s19, 4  ;;  %s214_s23 = scalar_lea.sflag [#allocation7], %s213_s2  ;;  %s227_s17 = int_to_ptr.vmem [resolvable:$true] %s226_s17 }
  0x26   : > { %529 = dma.hbm_to_vmem [thread:$0]  (!%p524_p8), %s225_s11, 128, %s227_s17, %s214_s23  }
  0x27   : > { %235 = sbr.rel (%p839_p3) target bundleno = 342 (0x156), region = 36  ;;  %s897_s7 = sand.u32 (!%p839_p3), 1, %s754_s16  }
  0x28   : > { %s900_s22 = sshll.u32 (!%p839_p3), %s897_s7, 3  ;;  %s238_s5 = scalar_lea.sflag (!%p839_p3), [#allocation4], %s897_s7 }
  0x29   : > { %s241_s13 = scalar_lea.vmem (!%p839_p3), [#allocation3], %s900_s22 }
  0x2c   : > { %733 = dma.done.wait (%p864_p12), %s238_s5, 128  }
  0x2d   : > { %735 = vsyncadd (%p864_p12), %s238_s5, 4294967168  ;;  %s247_s2 = sand.u32 1, %s831_s21   ;;  %s251_s19 = scalar_lea.vmem [#allocation6], %s900_s22 }
  0x2e   : > { %s248_s17 = scalar_lea.sflag [#allocation7], %s247_s2 }
  0x2f   : > { %737 = dma.done.wait (%p864_p12), %s248_s17, 128  }
  0x30   : > { %739 = vsyncadd (%p864_p12), %s248_s17, 4294967168 }
  0x31   : > { %741 = dma.done.wait (%p56_p1), [#allocation7], 2048  }
  0x32   : > { %743 = vsyncadd (%p56_p1), [#allocation7], 4294965248  ;;  %v307_v0 = vld [vmem:[#allocation8 + $0x78] sm:$0xff]  ;;  %v306_v1 = vld [vmem:[#allocation8 + $0x70] sm:$0xff]  ;;  %vm335_vm0 = vcmask 64512   ;;  %s506_s21 = sshll.u32 %s762_s18, 3 }
  0x33   : > { %308 = vmatpush.msra.mxu0 %v307_v0  ;;  %v305_v2 = vld [vmem:[#allocation8 + $0x68] sm:$0xff]  ;;  %v304_v3 = vld [vmem:[#allocation8 + $0x60] sm:$0xff]  ;;  %v303_v4 = vld [vmem:[#allocation8 + $0x58] sm:$0xff]  ;;  %s373_s24 = scalar_lea.hbm %s968_s4, %s506_s21  ;;  %s286_s26 = scalar_lea.vmem [#allocation9], %s900_s22 }
  0x34   : > { %v302_v5 = vld [vmem:[#allocation8 + $0x50] sm:$0xff]  ;;  %v301_v6 = vld [vmem:[#allocation8 + $0x48] sm:$0xff]  ;;  %v300_v7 = vld [vmem:[#allocation8 + $0x40] sm:$0xff]  ;;  %s375_s27 = sshll.u32 %s286_s26, 4  ;;  %s377_s28 = sshll.u32 %s373_s24, 4  ;;  %s376_s27 = int_to_ptr.vmem [resolvable:$true] %s375_s27  ;;  %s378_s28 = int_to_ptr.hbm [resolvable:$true] %s377_s28 }
  0x35   : > { %309 = vmatpush.msra.mxu0 %v306_v1  ;;  %v299_v8 = vld [vmem:[#allocation8 + $0x38] sm:$0xff]  ;;  %v298_v9 = vld [vmem:[#allocation8 + $0x30] sm:$0xff]  ;;  %v297_v10 = vld [vmem:[#allocation8 + $0x28] sm:$0xff]  ;;  %s362_s29 = scalar_lea.sflag [#allocation5], %s897_s7  ;;  %s694_s18 = sshra.s32 %s378_s28, 4  ;;  %s695_s18 = int_to_ptr.hbm [resolvable:$true] %s694_s18 }
  0x36   : > { %v296_v11 = vld [vmem:[#allocation8 + $0x20] sm:$0xff]  ;;  %v295_v12 = vld [vmem:[#allocation8 + $0x18] sm:$0xff]  ;;  %v294_v13 = vld [vmem:[#allocation8 + $0x10] sm:$0xff]  ;;  %s696_s30 = scalar_lea.hbm %s695_s18, 8  ;;  %s700_s23 = scalar_lea.hbm %s968_s4, 16 }
  0x37   : > { %310 = vmatpush.msra.mxu0 %v305_v2  ;;  %v293_v14 = vld [vmem:[#allocation8 + $0x8] sm:$0xff]  ;;  %v292_v15 = vld [vmem:[#allocation8] sm:$0xff]  ;;  %v329_v17 = vld [vmem:[%s251_s19] sm:$0xff]  ;;  %p697_p1 = scmp.ne.s32.totalorder %s695_s18, %s696_s30  ;;  %p701_p10 = scmp.lt.s32.totalorder %s695_s18, %s968_s4 }
  0x38   : > { %v291_v16 = vld [vmem:[%s241_s13] sm:$0xff]  ;;  %p702_p11 = scmp.lt.s32.totalorder %s700_s23, %s696_s30 }
  0x39   : > { %311 = vmatpush.msra.mxu0 %v304_v3  ;;  %v589_v19 = vld [vmem:[%s967_s3] ss:$0 sm:$0xff]  ;;  %p698_p3 = pnand %p697_p1, %p871_p4 }
  0x3a   : > { %p703_p12 = por %p702_p11, %p701_p10 }
  0x3b   : > { %312 = vmatpush.msra.mxu0 %v303_v4  ;;  %p699_p9 = pneg %p698_p3 }
  0x3d   : > { %313 = vmatpush.msra.mxu0 %v302_v5  ;;  %p704_p13 = pnand %p703_p12, %p699_p9 }
  0x3f   : > { %314 = vmatpush.msra.mxu0 %v301_v6 }
  0x41   : > { %315 = vmatpush.msra.mxu0 %v300_v7 }
  0x43   : > { %316 = vmatpush.msra.mxu0 %v299_v8 }
  0x45   : > { %317 = vmatpush.msra.mxu0 %v298_v9 }
  0x47   : > { %318 = vmatpush.msra.mxu0 %v297_v10 }
  0x49   : > { %319 = vmatpush.msra.mxu0 %v296_v11 }
  0x4b   : > { %320 = vmatpush.msra.mxu0 %v295_v12 }
  0x4d   : > { %321 = vmatpush.msra.mxu0 %v294_v13 }
  0x4f   : > { %322 = vmatpush.msra.mxu0 %v293_v14 }
  0x51   : > { %323 = vmatpush.msra.mxu0 %v292_v15 }
  0x52   : > { %324 = vmatmul.f32.vlgmr.msra.gmra.mxu0 %v291_v16 }
  0xcf   : > { %v325_v18 = vpop.f32.mrf.mxu0 }
  0xd0   : > { %354 = vmatpush.msra.mxu1 %v325_v18 }
  0xd1   : > { %504 = vmatmul.msk.f32.vlgmr.msra.gmra.mxu1 %vm335_vm0, %v329_v17 }
 0x14e   : > { %v356_v20 = vpop.f32.mrf.mxu1 }
 0x14f   : > { %v357_v21 = vadd.f32 %v589_v19, %v356_v20 }
 0x151   : > { %v359_v22 = vmax.f32 %v357_v21, 0.0 }
 0x153   : > { %360 = vst [vmem:[%s286_s26] sm:$0xff] %v359_v22 }
 0x154   : > { %707 = shalt.err (!%p704_p13)
}
 0x155   : > { %517 = dma.vmem_to_hbm [thread:$0]  (%p871_p4), %s376_s27, 128, %s378_s28, %s362_s29  }
 0x156 PF: > { %s389_s7 = sand.u32 1, %s750_s15   ;;  %p531_p0 = pnand %p494_p6, %p879_p7 }
 0x157   : > { %s390_s13 = scalar_lea.sflag [#allocation5], %s389_s7 }
 0x158   : > { %p532_p2 = pneg %p531_p0 }
 0x15a   : > { %745 = dma.done.wait (%p532_p2), %s390_s13, 128  }
 0x15b   : > { %747 = vsyncadd (%p532_p2), %s390_s13, 4294967168  ;;  %s23_s20 = sadd.s32 1, %s770_s20   ;;  %s983_s2 = sld [smem:[#allocation14_spill]] }
 0x15c   : > { %p20_p5 = scmp.ge.s32.totalorder %s23_s20, 4   ;;  %s984_s17 = sld [smem:[#allocation17_spill]] }
 0x15d   : > { %s985_s18 = sld [smem:[#allocation15_spill]]  ;;  %s987_s15 = smov %s754_s16 }
 0x15e   : > { %s986_s19 = sld [smem:[#allocation16_spill]]  ;;  %22 = sbr.rel (!%p20_p5) target bundleno = 10 (0xa), region = 102 }
 0x161   : > { %s988_s16 = smov %s983_s2 }
 0x163   :  { %396 = vsyncpa [#allocation4], 1 }
 0x164   :  { %398 = vsyncpa [#allocation4 + $0x1], 1 }
 0x165   :  { %399 = vsyncpa [#allocation7], 1 }
 0x166   :  { %401 = vsyncpa [#allocation7 + $0x1], 1 }
 0x167   :  { %402 = vsyncpa [#allocation5], 1 }
 0x168   :  { %404 = vsyncpa [#allocation5 + $0x1], 1 }

</bundles_post_ra>
